<compile_context>
chip_gen: v6e
topology: v6e:2x2x1
jax: 0.10.0
libtpu: 0.0.40
codegen_flags: <defaults>
</compile_context>

<pallas_src>
import numpy as np
import jax
import jax.numpy as jnp
from jax.experimental import pallas as pl
from jax.experimental.pallas import tpu as pltpu

STATE_DIM = 4        # CartPole-style low-dim state
NUM_ACTIONS = 2
H1 = 400             # fc1 out features (logical)
H2 = 300             # fc2 / fc2_action out features (logical)
H1P = 512            # 400 padded up to a lane multiple
H2P = 384            # 300 padded up to a lane multiple
KIN = 8              # state_dim + num_actions padded to a sublane multiple


def _cdiv(a, b):
    return (a + b - 1) // b


def _round_up(x, m):
    return ((x + m - 1) // m) * m


def _pad_to(x, shape):
    return jnp.pad(x, [(0, t - s) for s, t in zip(x.shape, shape)])


def critic_kernel(x_ref, win_ref, b1_ref, w2_ref, b2a_ref, wo_ref, bo_ref,
                  out_ref):
    x = x_ref[...]                                        # (TB, KIN) f32

    # Fused first layer [fc1 | fc2_action] on the MXU (K = 8, f32 for accuracy;
    # padded rows/cols of win are zero so padded lanes stay exactly 0).
    pre = jnp.dot(x, win_ref[...],
                  preferred_element_type=jnp.float32)     # (TB, H1P + H2P)
    h1 = jnp.maximum(pre[:, :H1P] + b1_ref[...], 0.0)     # (TB, H1P)  fc1+relu
    a_pre = pre[:, H1P:]                                  # (TB, H2P)  actions@Wa

    # fc2: the dominant matmul, bf16 on the MXU, f32 accumulation.
    h = jnp.dot(h1.astype(jnp.bfloat16), w2_ref[...],
                preferred_element_type=jnp.float32)       # (TB, H2P)
    h = jnp.maximum(h + a_pre + b2a_ref[...], 0.0)        # fused bias b2+ba

    # Output layer (N=1): NT matmul -> lane-dense (1, TB) row; padded cols of
    # wo are zero so padded H2P lanes contribute nothing.
    q = jax.lax.dot_general(wo_ref[...], h, (((1,), (1,)), ((), ())),
                            preferred_element_type=jnp.float32)   # (1, TB)
    out_ref[...] = (q + bo_ref[0, 0]).astype(out_ref.dtype).reshape(out_ref.shape)


def _choose_batch_tile(B):
    """Adaptive batch tile: single block up to 128 rows; otherwise <=512-row
    blocks, at least 2 grid steps (keeps both v7x TensorCores busy), and the
    block size tracks B so padding stays < TB."""
    if B <= 128:
        return _round_up(max(B, 1), 8)
    nblocks = max(2, _cdiv(B, 512))
    return _round_up(_cdiv(B, nblocks), 8)


def critic_forward(states, actions, kernel_params):
    """states: [B, state_dim], actions: [B, num_actions] -> Q: [B, 1]"""
    B = states.shape[0]
    (win, b1p, w2bf, b2ap, wop, bo) = kernel_params

    # Single fused input [states | actions], zero-padded to KIN columns.
    x = jnp.concatenate([states, actions], axis=1).astype(jnp.float32)
    if x.shape[1] != KIN:
        x = jnp.pad(x, ((0, 0), (0, KIN - x.shape[1])))

    TB = _choose_batch_tile(B)
    Bp = _round_up(B, TB)
    if Bp != B:
        x = jnp.pad(x, ((0, Bp - B), (0, 0)))
    nblk = Bp // TB

    resident = lambda shape: pl.BlockSpec(shape, lambda i: (0, 0))

    q = pl.pallas_call(
        critic_kernel,
        # Lane-dense output: each grid step writes one (1, TB) row.
        out_shape=jax.ShapeDtypeStruct((nblk, 1, TB), jnp.float32),
        grid=(nblk,),
        in_specs=[
            pl.BlockSpec((TB, KIN), lambda i: (i, 0)),    # [states | actions]
            resident(win.shape),                          # fused fc1|fc2_action W
            resident(b1p.shape),                          # b1 (lane-padded)
            resident(w2bf.shape),                         # W2 (bf16, padded)
            resident(b2ap.shape),                         # b2 + ba (fused)
            resident(wop.shape),                          # Wo^T (lane-dense)
            pl.BlockSpec(memory_space=pltpu.MemorySpace.SMEM),  # bo scalar
        ],
        out_specs=pl.BlockSpec((1, 1, TB), lambda i: (i, 0, 0)),
        compiler_params=pltpu.CompilerParams(
            dimension_semantics=("parallel",)),
    )(x, win, b1p, w2bf, b2ap, wop, bo)

    return q.reshape(-1)[:B].reshape(B, 1)


def init_params(key, state_dim, num_actions):
    """Deterministic init mirroring the PyTorch module's scheme.

    fc1/fc2/fc2_action weights: uniform(-1/sqrt(fan_in), 1/sqrt(fan_in))
    (biases use torch.nn.Linear's default, same range here);
    output layer weight & bias: uniform(-0.003, 0.003).
    Weights stored as [in_features, out_features] (logical, unpadded).
    """
    ks = jax.random.split(key, 8)

    def fanin_uniform(k, fan_in, shape):
        v = 1.0 / np.sqrt(fan_in)
        return jax.random.uniform(k, shape, jnp.float32, minval=-v, maxval=v)

    w1 = fanin_uniform(ks[0], state_dim, (state_dim, H1))
    b1 = fanin_uniform(ks[1], state_dim, (1, H1))
    w2 = fanin_uniform(ks[2], H1, (H1, H2))
    b2 = fanin_uniform(ks[3], H1, (1, H2))
    wa = fanin_uniform(ks[4], num_actions, (num_actions, H2))
    ba = fanin_uniform(ks[5], num_actions, (1, H2))
    wo = jax.random.uniform(ks[6], (H2, 1), jnp.float32, minval=-0.003, maxval=0.003)
    bo = jax.random.uniform(ks[7], (1, 1), jnp.float32, minval=-0.003, maxval=0.003)
    return (w1, b1, w2, b2, wa, ba, wo, bo)


def prepare_params(raw):
    """One-time, off-kernel param packing:
    - fuse fc1 and fc2_action weights into one (KIN, H1P+H2P) matrix so the
      first layer is a single small MXU matmul on [states | actions],
    - zero-pad to lane-aligned shapes,
    - cast W2 to bf16 (MXU-native rate, half the DMA),
    - fuse b2 + ba."""
    (w1, b1, w2, b2, wa, ba, wo, bo) = raw
    sd, na = w1.shape[0], wa.shape[0]
    win = jnp.zeros((KIN, H1P + H2P), jnp.float32)
    win = win.at[:sd, :H1].set(w1)                    # fc1 block
    win = win.at[sd:sd + na, H1P:H1P + H2].set(wa)    # fc2_action block
    b1p = _pad_to(b1, (1, H1P))
    w2bf = _pad_to(w2, (H1P, H2P)).astype(jnp.bfloat16)
    b2ap = _pad_to(b2 + ba, (1, H2P))
    wop = _pad_to(wo.T, (1, H2P))
    return (win, b1p, w2bf, b2ap, wop, bo)


def critic_ref(states, actions, raw_params):
    """Pure-JAX f32 reference (unpadded logical math) for correctness checks."""
    (w1, b1, w2, b2, wa, ba, wo, bo) = raw_params
    h1 = jnp.maximum(states @ w1 + b1, 0.0)
    h = jnp.maximum(h1 @ w2 + b2 + actions @ wa + ba, 0.0)
    return h @ wo + bo


if __name__ == "__main__":
    key = jax.random.PRNGKey(0)
    k_s, k_a, k_s2, k_a2, k_p = jax.random.split(key, 5)

    raw_params = init_params(k_p, STATE_DIM, NUM_ACTIONS)
    kernel_params = prepare_params(raw_params)

    # bf16 fc2 => tolerances loosened vs the f32 reference (per review).
    RTOL, ATOL = 3e-2, 1e-3

    # Small demo batch (single-block grid).
    states = jax.random.normal(k_s, (8, STATE_DIM), jnp.float32)
    actions = jax.random.normal(k_a, (8, NUM_ACTIONS), jnp.float32)
    q = jax.block_until_ready(critic_forward(states, actions, kernel_params))
    q_ref = critic_ref(states, actions, raw_params)
    np.testing.assert_allclose(np.asarray(q), np.asarray(q_ref), rtol=RTOL, atol=ATOL)

    # Awkward batch size exercising the adaptive-tile, 2-step grid path.
    states2 = jax.random.normal(k_s2, (300, STATE_DIM), jnp.float32)
    actions2 = jax.random.normal(k_a2, (300, NUM_ACTIONS), jnp.float32)
    q2 = jax.block_until_ready(critic_forward(states2, actions2, kernel_params))
    q2_ref = critic_ref(states2, actions2, raw_params)
    np.testing.assert_allclose(np.asarray(q2), np.asarray(q2_ref), rtol=RTOL, atol=ATOL)

    print("KERNEL_OK")
</pallas_src>

<mosaic_0001>
module attributes {stable_mosaic.version = 11 : i64} {
  func.func @critic_kernel(%arg0: i32, %arg1: memref<8x8xf32, #tpu.memory_space<vmem>>, %arg2: memref<8x896xf32, #tpu.memory_space<vmem>>, %arg3: memref<1x512xf32, #tpu.memory_space<vmem>>, %arg4: memref<512x384xbf16, #tpu.memory_space<vmem>>, %arg5: memref<1x384xf32, #tpu.memory_space<vmem>>, %arg6: memref<1x384xf32, #tpu.memory_space<vmem>>, %arg7: memref<1x1xf32, #tpu.memory_space<smem>>, %arg8: memref<1x1x8xf32, #tpu.memory_space<vmem>>) attributes {dimension_semantics = [#tpu.dimension_semantics<parallel>], iteration_bounds = array<i64: 1>, scalar_prefetch = 0 : i64, scratch_operands = 0 : i64, tpu.core_type = #tpu.core_type<tc>, window_params = [{transform_indices = @transform_0, window_bounds = array<i64: 8, 8>}, {pipeline_mode = #tpu.pipeline_mode<synchronous>, transform_indices = @transform_1, window_bounds = array<i64: 8, 896>}, {pipeline_mode = #tpu.pipeline_mode<synchronous>, transform_indices = @transform_2, window_bounds = array<i64: 1, 512>}, {pipeline_mode = #tpu.pipeline_mode<synchronous>, transform_indices = @transform_3, window_bounds = array<i64: 512, 384>}, {pipeline_mode = #tpu.pipeline_mode<synchronous>, transform_indices = @transform_4, window_bounds = array<i64: 1, 384>}, {pipeline_mode = #tpu.pipeline_mode<synchronous>, transform_indices = @transform_5, window_bounds = array<i64: 1, 384>}, {transform_indices = @transform_6, window_bounds = array<i64: 1, 1>}, {transform_indices = @transform_7, window_bounds = array<i64: 1, 1, 8>}]} {
    %c0 = arith.constant 0 : index
    %c0_0 = arith.constant 0 : index
    %0 = vector.load %arg1[%c0, %c0_0] : memref<8x8xf32, #tpu.memory_space<vmem>>, vector<8x8xf32>
    %c0_1 = arith.constant 0 : index
    %c0_2 = arith.constant 0 : index
    %1 = vector.load %arg2[%c0_1, %c0_2] : memref<8x896xf32, #tpu.memory_space<vmem>>, vector<8x896xf32>
    %cst = arith.constant dense<0.000000e+00> : vector<8x896xf32>
    %2 = tpu.matmul %0, %1, %cst {dimension_numbers = #tpu.dot_dimension_numbers<[1], [0], [0], [1], [0, 0, 1, 1], [], []>} : vector<8x8xf32>, vector<8x896xf32>, vector<8x896xf32> -> vector<8x896xf32>
    %3 = vector.extract_strided_slice %2 {offsets = [0, 0], sizes = [8, 512], strides = [1, 1]} : vector<8x896xf32> to vector<8x512xf32>
    %c0_3 = arith.constant 0 : index
    %c0_4 = arith.constant 0 : index
    %4 = vector.load %arg3[%c0_3, %c0_4] : memref<1x512xf32, #tpu.memory_space<vmem>>, vector<1x512xf32>
    %5 = vector.broadcast %4 : vector<1x512xf32> to vector<8x512xf32>
    %6 = arith.addf %3, %5 : vector<8x512xf32>
    %cst_5 = arith.constant 0.000000e+00 : f32
    %7 = vector.broadcast %cst_5 : f32 to vector<8x512xf32>
    %8 = arith.maximumf %6, %7 : vector<8x512xf32>
    %9 = vector.extract_strided_slice %2 {offsets = [0, 512], sizes = [8, 384], strides = [1, 1]} : vector<8x896xf32> to vector<8x384xf32>
    %10 = arith.truncf %8 : vector<8x512xf32> to vector<8x512xbf16>
    %c0_6 = arith.constant 0 : index
    %c0_7 = arith.constant 0 : index
    %11 = vector.load %arg4[%c0_6, %c0_7] : memref<512x384xbf16, #tpu.memory_space<vmem>>, vector<512x384xbf16>
    %cst_8 = arith.constant dense<0.000000e+00> : vector<8x384xf32>
    %12 = tpu.matmul %10, %11, %cst_8 {dimension_numbers = #tpu.dot_dimension_numbers<[1], [0], [0], [1], [0, 0, 1, 1], [], []>} : vector<8x512xbf16>, vector<512x384xbf16>, vector<8x384xf32> -> vector<8x384xf32>
    %13 = arith.addf %12, %9 : vector<8x384xf32>
    %c0_9 = arith.constant 0 : index
    %c0_10 = arith.constant 0 : index
    %14 = vector.load %arg5[%c0_9, %c0_10] : memref<1x384xf32, #tpu.memory_space<vmem>>, vector<1x384xf32>
    %15 = vector.broadcast %14 : vector<1x384xf32> to vector<8x384xf32>
    %16 = arith.addf %13, %15 : vector<8x384xf32>
    %cst_11 = arith.constant 0.000000e+00 : f32
    %17 = vector.broadcast %cst_11 : f32 to vector<8x384xf32>
    %18 = arith.maximumf %16, %17 : vector<8x384xf32>
    %c0_12 = arith.constant 0 : index
    %c0_13 = arith.constant 0 : index
    %19 = vector.load %arg6[%c0_12, %c0_13] : memref<1x384xf32, #tpu.memory_space<vmem>>, vector<1x384xf32>
    %cst_14 = arith.constant dense<0.000000e+00> : vector<1x8xf32>
    %20 = tpu.matmul %19, %18, %cst_14 {dimension_numbers = #tpu.dot_dimension_numbers<[1], [1], [0], [0], [0, 0, 1, 0], [], []>} : vector<1x384xf32>, vector<8x384xf32>, vector<1x8xf32> -> vector<1x8xf32>
    %c0_15 = arith.constant 0 : index
    %c0_16 = arith.constant 0 : index
    %21 = memref.load %arg7[%c0_15, %c0_16] : memref<1x1xf32, #tpu.memory_space<smem>>
    %22 = vector.broadcast %21 : f32 to vector<1x8xf32>
    %23 = arith.addf %20, %22 : vector<1x8xf32>
    %24 = vector.shape_cast %23 : vector<1x8xf32> to vector<1x1x8xf32>
    %c0_17 = arith.constant 0 : index
    %c0_18 = arith.constant 0 : index
    %c0_19 = arith.constant 0 : index
    %25 = vector.load %arg8[%c0_17, %c0_18, %c0_19] : memref<1x1x8xf32, #tpu.memory_space<vmem>>, vector<1x1x8xf32>
    tpu.vector_store %arg8[%c0_17, %c0_18, %c0_19], %24 {strides = array<i32>} : memref<1x1x8xf32, #tpu.memory_space<vmem>>, vector<1x1x8xf32>,
    return
  }
  func.func @transform_0(%arg0: i32) -> (i32, i32) {
    %c0_i32 = arith.constant 0 : i32
    %c0_i32_0 = arith.constant 0 : i32
    return %arg0, %c0_i32 : i32, i32
  }
  func.func @transform_1(%arg0: i32) -> (i32, i32) {
    %c0_i32 = arith.constant 0 : i32
    %c0_i32_0 = arith.constant 0 : i32
    %c0_i32_1 = arith.constant 0 : i32
    return %c0_i32, %c0_i32_0 : i32, i32
  }
  func.func @transform_2(%arg0: i32) -> (i32, i32) {
    %c0_i32 = arith.constant 0 : i32
    %c0_i32_0 = arith.constant 0 : i32
    %c0_i32_1 = arith.constant 0 : i32
    return %c0_i32, %c0_i32_0 : i32, i32
  }
  func.func @transform_3(%arg0: i32) -> (i32, i32) {
    %c0_i32 = arith.constant 0 : i32
    %c0_i32_0 = arith.constant 0 : i32
    %c0_i32_1 = arith.constant 0 : i32
    return %c0_i32, %c0_i32_0 : i32, i32
  }
  func.func @transform_4(%arg0: i32) -> (i32, i32) {
    %c0_i32 = arith.constant 0 : i32
    %c0_i32_0 = arith.constant 0 : i32
    %c0_i32_1 = arith.constant 0 : i32
    return %c0_i32, %c0_i32_0 : i32, i32
  }
  func.func @transform_5(%arg0: i32) -> (i32, i32) {
    %c0_i32 = arith.constant 0 : i32
    %c0_i32_0 = arith.constant 0 : i32
    %c0_i32_1 = arith.constant 0 : i32
    return %c0_i32, %c0_i32_0 : i32, i32
  }
  func.func @transform_6(%arg0: i32) -> (i32, i32) {
    %c0_i32 = arith.constant 0 : i32
    %c0_i32_0 = arith.constant 0 : i32
    %c0_i32_1 = arith.constant 0 : i32
    return %c0_i32, %c0_i32_0 : i32, i32
  }
  func.func @transform_7(%arg0: i32) -> (i32, i32, i32) {
    %c0_i32 = arith.constant 0 : i32
    %c0_i32_0 = arith.constant 0 : i32
    %c0_i32_1 = arith.constant 0 : i32
    return %arg0, %c0_i32, %c0_i32_0 : i32, i32, i32
  }
}

</mosaic_0001>

<bundles_post_ra>
// kernel: tpu_custom_call.1
= control target key start
LH: loop header
LB: loop body
LE: loop exit
PB: predicated region body
PF: predicated region fallthrough
CT: control target
= control target key end

     0   :  { %13 = vsyncpa [#allocation4], 0  ;;  %s1888_s0 = inlined_call_operand.hbm [shape: f32[8,8], index: 0, kind: input, shape index: {}]   ;;  %s1889_s1 = inlined_call_operand.hbm [shape: f32[8,896], index: 1, kind: input, shape index: {}]   ;;  %s1890_s2 = inlined_call_operand.vmem [shape: f32[1,512], index: 2, kind: input, shape index: {}]   ;;  %s1891_s3 = inlined_call_operand.hbm [shape: bf16[512,384], index: 3, kind: input, shape index: {}]   ;;  %s1892_s4 = inlined_call_operand.vmem [shape: f32[1,384], index: 4, kind: input, shape index: {}]   ;;  %s1893_s5 = inlined_call_operand.vmem [shape: f32[1,384], index: 5, kind: input, shape index: {}]   ;;  %s1894_s6 = inlined_call_operand.<no memory space> [shape: f32[1,1], index: 6, kind: input, shape index: {}]   ;;  %s1895_s7 = inlined_call_operand.hbm [shape: f32[1,1,8], index: 7, kind: output, shape index: {}]  }
   0x1   :  { %14 = vsyncpa [#allocation7], 0 }
   0x2   :  { %15 = vsyncpa [#allocation5], 0  ;;  %s1777_s24 = smov [#allocation6]   ;;  %s1778_s26 = smov [#allocation3]  }
   0x3   :  { %s32_s25 = sshll.u32 %s1777_s24, 4  ;;  %s22_s27 = sshll.u32 %s1778_s26, 4  ;;  %s33_s25 = int_to_ptr.vmem [resolvable:$true] %s32_s25  ;;  %s23_s27 = int_to_ptr.vmem [resolvable:$true] %s22_s27 }
   0x4   :  { %s1699_s28 = scalar_lea.vmem %s33_s25, 896  ;;  %p1704_p1 = scmp.lt.s32.totalorder %s33_s25, %s33_s25 }
   0x5   :  { %p1700_p0 = scmp.ne.s32.totalorder %s33_s25, %s1699_s28  ;;  %p1705_p2 = scmp.lt.s32.totalorder %s1699_s28, %s1699_s28 }
   0x7   :  { %p1706_p3 = por %p1705_p2, %p1704_p1 }
   0x9   :  { %p1707_p4 = pnand %p1706_p3, %p1700_p0 }
   0xb   :  { %1710 = shalt.err (!%p1707_p4)
}
   0xc   :  { %35 = dma.hbm_to_vmem [thread:$0]  %s1889_s1, 896, %s33_s25, [#allocation7]  }
   0xd   :  { %s1719_s8 = scalar_lea.vmem %s23_s27, 128  ;;  %p1724_p6 = scmp.lt.s32.totalorder %s23_s27, %s23_s27 }
   0xe   :  { %p1720_p5 = scmp.ne.s32.totalorder %s23_s27, %s1719_s8  ;;  %p1725_p7 = scmp.lt.s32.totalorder %s1719_s8, %s1719_s8 }
  0x10   :  { %p1726_p8 = por %p1725_p7, %p1724_p6 }
  0x12   :  { %p1727_p9 = pnand %p1726_p8, %p1720_p5 }
  0x14   :  { %1730 = shalt.err (!%p1727_p9)
}
  0x15   :  { %25 = dma.hbm_to_vmem [thread:$0]  %s1888_s0, 128, %s23_s27, [#allocation4]  }
  0x16   :  { %s1779_s11 = smov [#allocation8]  }
  0x17   :  { %s43_s12 = sshll.u32 %s1779_s11, 4  ;;  %s44_s12 = int_to_ptr.vmem [resolvable:$true] %s43_s12 }
  0x18   :  { %s1739_s13 = scalar_lea.vmem %s44_s12, 12288  ;;  %p1744_p11 = scmp.lt.s32.totalorder %s44_s12, %s44_s12 }
  0x19   :  { %p1740_p10 = scmp.ne.s32.totalorder %s44_s12, %s1739_s13  ;;  %p1745_p12 = scmp.lt.s32.totalorder %s1739_s13, %s1739_s13 }
  0x1b   :  { %p1746_p13 = por %p1745_p12, %p1744_p11 }
  0x1d   :  { %p1747_p0 = pnand %p1746_p13, %p1740_p10 }
  0x1f   :  { %1750 = shalt.err (!%p1747_p0)
}
  0x20   :  { %s1780_s1 = smov 192   ;;  %s1781_s14 = smov 12  }
  0x21   :  { %49 = dma.hbm_to_vmem [thread:$0]  %s1891_s3, 12288, %s44_s12, [#allocation7], %s1780_s1, %s1780_s1, %s1781_s14  }
  0x22   :  { %1771 = dma.done.wait [#allocation4], 128  }
  0x23   :  { %1772 = vsyncadd [#allocation4], 4294967168 }
  0x24   :  { %1773 = dma.done.wait [#allocation7], 13184  }
  0x25   :  { %1774 = vsyncadd [#allocation7], 4294954112  ;;  %v1782_v0 = vmov 0.0   ;;  %v68_v1 = vld [vmem:[#allocation6 + $0x8] sm:$0xff]  ;;  %v70_v2 = vld [vmem:[#allocation6 + $0x18] sm:$0xff]  ;;  %vm74_vm0 = vcmask 64512  }
  0x26   :  { %142 = vmatprep.mubr.f32.mxu0 %v1782_v0  ;;  %213 = vmatprep.mubr.f32.mxu1 %v1782_v0  ;;  %v67_v3 = vld [vmem:[#allocation6] sm:$0xff]  ;;  %v69_v4 = vld [vmem:[#allocation6 + $0x10] sm:$0xff]  ;;  %v66_v5 = vld [vmem:[#allocation3] sm:$0xff]  ;;  %vm1783_vm1 = vmmov 0   ;;  %s1784_s20 = smov [#allocation9]   ;;  %vm1379_vm2 = vcmask 57344  }
  0x27   :  { %108 = vmatprep.subr.mxu0 %v68_v1  ;;  %179 = vmatprep.subr.mxu1 %v70_v2  ;;  %v72_v6 = vld [vmem:[#allocation6 + $0x28] sm:$0xff]  ;;  %v71_v7 = vld [vmem:[#allocation6 + $0x20] sm:$0xff]  ;;  %v73_v8 = vld [vmem:[#allocation6 + $0x30] sm:$0xff]  ;;  %s1387_s21 = sshll.u32 %s1784_s20, 4  ;;  %s1388_s21 = int_to_ptr.vmem [resolvable:$true] %s1387_s21 }
  0x28   :  { %109 = vmatpush1.msra.mxu0 %v67_v3  ;;  %180 = vmatpush1.msra.mxu1 %v69_v4  ;;  %v1563_v9 = vld [vmem:[#allocation8 + $0xa8] ss:$12 sps:$4 sm:$0xff]   ;;  %v1565_v10 = vld [vmem:[#allocation8 + $0xac] ss:$12 sps:$4 sm:$0xff]   ;;  %v1569_v15 = vld [vmem:[#allocation8 + $0x90] ss:$12 sps:$4 sm:$0xff]   ;;  %p1756_p2 = scmp.lt.s32.totalorder %s1388_s21, %s1388_s21 }
  0x29   :  { %1397 = vmatmul.mubr.msk.f32.vlgmr.msra.gmra.mxu0 %vm74_vm0, %v66_v5  ;;  %1398 = vmatmul.mubr.msk.f32.vlgmr.msra.gmra.mxu1 %vm74_vm0, %v66_v5  ;;  %v1566_v11 = vld [vmem:[#allocation8 + $0x228] ss:$12 sps:$4 sm:$0xff]   ;;  %v1568_v12 = vld [vmem:[#allocation8 + $0x22c] ss:$12 sps:$4 sm:$0xff]   ;;  %v1572_v16 = vld [vmem:[#allocation8 + $0x210] ss:$12 sps:$4 sm:$0xff]  }
  0x2a   :  { %250 = vmatprep.subr.mxu0 %v72_v6  ;;  %284 = vmatprep.mubr.f32.mxu0 %v1782_v0  ;;  %v1571_v13 = vld [vmem:[#allocation8 + $0x94] ss:$12 sps:$4 sm:$0xff]   ;;  %v1577_v17 = vld [vmem:[#allocation8 + $0x7c] ss:$12 sps:$4 sm:$0xff]   ;;  %v1575_v19 = vld [vmem:[#allocation8 + $0x78] ss:$12 sps:$4 sm:$0xff]  }
  0x2b   :  { %251 = vmatpush1.msra.mxu0 %v71_v7  ;;  %1545 = vmatprep.subr.mxu1 %v1782_v0  ;;  %v1574_v14 = vld [vmem:[#allocation8 + $0x214] ss:$12 sps:$4 sm:$0xff]   ;;  %v1580_v18 = vld [vmem:[#allocation8 + $0x1fc] ss:$12 sps:$4 sm:$0xff]   ;;  %v1578_v20 = vld [vmem:[#allocation8 + $0x1f8] ss:$12 sps:$4 sm:$0xff]  }
  0x2c   :  { %1546 = vmatpush3.msra.mxu1 %v73_v8  ;;  %1547 = vmatprep.mubr.msk.f32.mxu1 %vm1783_vm1, %v1782_v0  ;;  %v1583_v21 = vld [vmem:[#allocation8 + $0x64] ss:$12 sps:$4 sm:$0xff]   ;;  %v1581_v23 = vld [vmem:[#allocation8 + $0x60] ss:$12 sps:$4 sm:$0xff]   ;;  %v1587_v27 = vld [vmem:[#allocation8 + $0x48] ss:$12 sps:$4 sm:$0xff]  }
  0x2d   :  { %1399 = vmatmul.mubr.msk.f32.vlgmr.msra.gmra.mxu0 %vm74_vm0, %v66_v5  ;;  %1035 = vmatprep.subr.bf16.mxu0 %v1565_v10  ;;  %v1586_v22 = vld [vmem:[#allocation8 + $0x1e4] ss:$12 sps:$4 sm:$0xff]   ;;  %v1584_v24 = vld [vmem:[#allocation8 + $0x1e0] ss:$12 sps:$4 sm:$0xff]   ;;  %v1590_v28 = vld [vmem:[#allocation8 + $0x1c8] ss:$12 sps:$4 sm:$0xff]  }
  0x2e   :  { %1076 = vmatprep.subr.bf16.mxu1 %v1568_v12  ;;  %1548 = vmatmul.mubr.msk.f32.vlgmr.msra.gmra.mxu1 %vm74_vm0, %v66_v5  ;;  %v1589_v25 = vld [vmem:[#allocation8 + $0x4c] ss:$12 sps:$4 sm:$0xff]   ;;  %v1595_v29 = vld [vmem:[#allocation8 + $0x34] ss:$12 sps:$4 sm:$0xff]   ;;  %v1593_v31 = vld [vmem:[#allocation8 + $0x30] ss:$12 sps:$4 sm:$0xff]   ;;  %v363_v12 = vlaneseq }
  0x2f   :  { %1036 = vmatpush1.bf16.msra.mxu0 %v1563_v9  ;;  %1077 = vmatpush1.bf16.msra.mxu1 %v1566_v11  ;;  %v1592_v26 = vld [vmem:[#allocation8 + $0x1cc] ss:$12 sps:$4 sm:$0xff]   ;;  %v1598_v30 = vld [vmem:[#allocation8 + $0x1b4] ss:$12 sps:$4 sm:$0xff]   ;;  %v1596_v32 = vld [vmem:[#allocation8 + $0x1b0] ss:$12 sps:$4 sm:$0xff]  }
  0x30   :  { %1037 = vmatprep.subr.bf16.mxu0 %v1571_v13  ;;  %1078 = vmatprep.subr.bf16.mxu1 %v1574_v14  ;;  %v1601_v33 = vld [vmem:[#allocation8 + $0x1c] ss:$12 sps:$4 sm:$0xff]   ;;  %v1599_v35 = vld [vmem:[#allocation8 + $0x18] ss:$12 sps:$4 sm:$0xff]   ;;  %v1605_v39 = vld [vmem:[#allocation8] ss:$12 sps:$4 sm:$0xff]  }
  0x31   :  { %v1604_v34 = vld [vmem:[#allocation8 + $0x19c] ss:$12 sps:$4 sm:$0xff]   ;;  %v1602_v36 = vld [vmem:[#allocation8 + $0x198] ss:$12 sps:$4 sm:$0xff]   ;;  %v1608_v40 = vld [vmem:[#allocation8 + $0x180] ss:$12 sps:$4 sm:$0xff]  }
  0x32   :  { %v1607_v37 = vld [vmem:[#allocation8 + $0x4] ss:$12 sps:$4 sm:$0xff]   ;;  %v1613_v41 = vld [vmem:[#allocation8 + $0x16c] ss:$12 sps:$4 sm:$0xff]   ;;  %v1611_v43 = vld [vmem:[#allocation8 + $0x168] ss:$12 sps:$4 sm:$0xff]  }
  0x33   :  { %1038 = vmatpush1.bf16.msra.mxu0 %v1569_v15  ;;  %1079 = vmatpush1.bf16.msra.mxu1 %v1572_v16  ;;  %v1610_v38 = vld [vmem:[#allocation8 + $0x184] ss:$12 sps:$4 sm:$0xff]   ;;  %v1616_v42 = vld [vmem:[#allocation8 + $0x2ec] ss:$12 sps:$4 sm:$0xff]   ;;  %v1614_v44 = vld [vmem:[#allocation8 + $0x2e8] ss:$12 sps:$4 sm:$0xff]  }
  0x34   :  { %1039 = vmatprep.subr.bf16.mxu0 %v1577_v17  ;;  %1080 = vmatprep.subr.bf16.mxu1 %v1580_v18  ;;  %v1619_v45 = vld [vmem:[#allocation8 + $0x154] ss:$12 sps:$4 sm:$0xff]   ;;  %v1617_v47 = vld [vmem:[#allocation8 + $0x150] ss:$12 sps:$4 sm:$0xff]   ;;  %v1623_v51 = vld [vmem:[#allocation8 + $0x138] ss:$12 sps:$4 sm:$0xff]  }
  0x35   :  { %v1622_v46 = vld [vmem:[#allocation8 + $0x2d4] ss:$12 sps:$4 sm:$0xff]   ;;  %v1620_v48 = vld [vmem:[#allocation8 + $0x2d0] ss:$12 sps:$4 sm:$0xff]   ;;  %v1626_v52 = vld [vmem:[#allocation8 + $0x2b8] ss:$12 sps:$4 sm:$0xff]  }
  0x36   :  { %v1625_v49 = vld [vmem:[#allocation8 + $0x13c] ss:$12 sps:$4 sm:$0xff]   ;;  %v1631_v53 = vld [vmem:[#allocation8 + $0x124] ss:$12 sps:$4 sm:$0xff]   ;;  %v1629_v55 = vld [vmem:[#allocation8 + $0x120] ss:$12 sps:$4 sm:$0xff]  }
  0x37   :  { %1040 = vmatpush1.bf16.msra.mxu0 %v1575_v19  ;;  %1081 = vmatpush1.bf16.msra.mxu1 %v1578_v20  ;;  %v1628_v50 = vld [vmem:[#allocation8 + $0x2bc] ss:$12 sps:$4 sm:$0xff]   ;;  %v1634_v54 = vld [vmem:[#allocation8 + $0x2a4] ss:$12 sps:$4 sm:$0xff]   ;;  %v1632_v56 = vld [vmem:[#allocation8 + $0x2a0] ss:$12 sps:$4 sm:$0xff]  }
  0x38   :  { %1041 = vmatprep.subr.bf16.mxu0 %v1583_v21  ;;  %1082 = vmatprep.subr.bf16.mxu1 %v1586_v22  ;;  %v1637_v57 = vld [vmem:[#allocation8 + $0x10c] ss:$12 sps:$4 sm:$0xff]   ;;  %v1635_v59 = vld [vmem:[#allocation8 + $0x108] ss:$12 sps:$4 sm:$0xff]   ;;  %v1641_v63 = vld [vmem:[#allocation8 + $0xf0] ss:$12 sps:$4 sm:$0xff]  }
  0x39   :  { %v1640_v58 = vld [vmem:[#allocation8 + $0x28c] ss:$12 sps:$4 sm:$0xff]   ;;  %v1638_v60 = vld [vmem:[#allocation8 + $0x288] ss:$12 sps:$4 sm:$0xff]   ;;  %v1644_v1 = vld [vmem:[#allocation8 + $0x270] ss:$12 sps:$4 sm:$0xff]  }
  0x3a   :  { %v1643_v61 = vld [vmem:[#allocation8 + $0xf4] ss:$12 sps:$4 sm:$0xff]   ;;  %v1649_v2 = vld [vmem:[#allocation8 + $0xdc] ss:$12 sps:$4 sm:$0xff]   ;;  %v1647_v4 = vld [vmem:[#allocation8 + $0xd8] ss:$12 sps:$4 sm:$0xff]  }
  0x3b   :  { %1042 = vmatpush1.bf16.msra.mxu0 %v1581_v23  ;;  %1083 = vmatpush1.bf16.msra.mxu1 %v1584_v24  ;;  %v1646_v62 = vld [vmem:[#allocation8 + $0x274] ss:$12 sps:$4 sm:$0xff]   ;;  %v1652_v3 = vld [vmem:[#allocation8 + $0x25c] ss:$12 sps:$4 sm:$0xff]   ;;  %v1650_v5 = vld [vmem:[#allocation8 + $0x258] ss:$12 sps:$4 sm:$0xff]  }
  0x3c   :  { %1043 = vmatprep.subr.bf16.mxu0 %v1589_v25  ;;  %1084 = vmatprep.subr.bf16.mxu1 %v1592_v26  ;;  %v1655_v6 = vld [vmem:[#allocation8 + $0xc4] ss:$12 sps:$4 sm:$0xff]   ;;  %v1653_v8 = vld [vmem:[#allocation8 + $0xc0] ss:$12 sps:$4 sm:$0xff]   ;;  %v364_v13 = vshrl.u32 %v363_v12, 7  ;;  %s1751_s22 = scalar_lea.vmem %s1388_s21, 16 }
  0x3d   :  { %v1658_v7 = vld [vmem:[#allocation8 + $0x244] ss:$12 sps:$4 sm:$0xff]   ;;  %v1656_v9 = vld [vmem:[#allocation8 + $0x240] ss:$12 sps:$4 sm:$0xff]   ;;  %p1752_p1 = scmp.ne.s32.totalorder %s1388_s21, %s1751_s22  ;;  %s1755_s23 = scalar_lea.vmem %s1388_s21, 32 }
  0x3e   :  { %v1659_v10 = vld [vmem:[#allocation8 + $0x170] ss:$12 sps:$4 sm:$0xff]   ;;  %v1844_v14 = vsub.s32 0, %v364_v13  ;;  %v1846_v15 = vsub.s32 2, %v364_v13  ;;  %v361_v16 = vld [vmem:[%s1890_s2] sm:$0xf]  ;;  %p1757_p3 = scmp.lt.s32.totalorder %s1755_s23, %s1751_s22 }
  0x3f   :  { %1044 = vmatpush1.bf16.msra.mxu0 %v1587_v27  ;;  %1085 = vmatpush1.bf16.msra.mxu1 %v1590_v28  ;;  %v1660_v11 = vld [vmem:[#allocation8 + $0x2f0] ss:$12 sps:$4 sm:$0xff]   ;;  %v1851_v17 = vsub.s32 1, %v364_v13  ;;  %v377_v18 = vsub.s32 3, %v364_v13  ;;  %v1197_v12 = vld [vmem:[%s1892_s4] sm:$0x7] }
  0x40   :  { %1045 = vmatprep.subr.bf16.mxu0 %v1595_v29  ;;  %1086 = vmatprep.subr.bf16.mxu1 %v1598_v30  ;;  %v366_v19 = vrot.slane %v361_v16, %v1844_v14  ;;  %v374_v20 = vrot.slane %v361_v16, %v1846_v15  ;;  %p1758_p4 = por %p1757_p3, %p1756_p2 }
  0x41   :  { %v370_v21 = vrot.slane %v361_v16, %v1851_v17  ;;  %v378_v22 = vrot.slane %v361_v16, %v377_v18 }
  0x42   :  { %p1759_p5 = pnand %p1758_p4, %p1752_p1 }
  0x43   :  { %1046 = vmatpush1.bf16.msra.mxu0 %v1593_v31  ;;  %1087 = vmatpush1.bf16.msra.mxu1 %v1596_v32 }
  0x44   :  { %1047 = vmatprep.subr.bf16.mxu0 %v1601_v33  ;;  %1088 = vmatprep.subr.bf16.mxu1 %v1604_v34 }
  0x47   :  { %1048 = vmatpush1.bf16.msra.mxu0 %v1599_v35  ;;  %1089 = vmatpush1.bf16.msra.mxu1 %v1602_v36 }
  0x48   :  { %1049 = vmatprep.subr.bf16.mxu0 %v1607_v37  ;;  %1090 = vmatprep.subr.bf16.mxu1 %v1610_v38 }
  0x4b   :  { %1050 = vmatpush1.bf16.msra.mxu0 %v1605_v39  ;;  %1091 = vmatpush1.bf16.msra.mxu1 %v1608_v40  ;;  %v1661_v39 = vld [vmem:[#allocation8 + $0xb0] ss:$12 sps:$4 sm:$0xff]  }
  0x4c   :  { %1051 = vmatprep.subr.bf16.mxu0 %v1613_v41  ;;  %1092 = vmatprep.subr.bf16.mxu1 %v1616_v42  ;;  %v1662_v40 = vld [vmem:[#allocation8 + $0x230] ss:$12 sps:$4 sm:$0xff]  }
  0x4f   :  { %1052 = vmatpush2.bf16.msra.mxu0 %v1611_v43  ;;  %1093 = vmatpush2.bf16.msra.mxu1 %v1614_v44  ;;  %v1663_v43 = vld [vmem:[#allocation8 + $0x158] ss:$12 sps:$4 sm:$0xff]  }
  0x50   :  { %1053 = vmatprep.subr.bf16.mxu0 %v1619_v45  ;;  %1094 = vmatprep.subr.bf16.mxu1 %v1622_v46  ;;  %v1664_v44 = vld [vmem:[#allocation8 + $0x2d8] ss:$12 sps:$4 sm:$0xff]  }
  0x51   :  { %v1665_v45 = vld [vmem:[#allocation8 + $0x98] ss:$12 sps:$4 sm:$0xff]  }
  0x52   :  { %v1666_v46 = vld [vmem:[#allocation8 + $0x218] ss:$12 sps:$4 sm:$0xff]  }
  0x53   :  { %1054 = vmatpush2.bf16.msra.mxu0 %v1617_v47  ;;  %1095 = vmatpush2.bf16.msra.mxu1 %v1620_v48  ;;  %v1667_v47 = vld [vmem:[#allocation8 + $0x140] ss:$12 sps:$4 sm:$0xff]  }
  0x54   :  { %1055 = vmatprep.subr.bf16.mxu0 %v1625_v49  ;;  %1096 = vmatprep.subr.bf16.mxu1 %v1628_v50  ;;  %v1668_v48 = vld [vmem:[#allocation8 + $0x2c0] ss:$12 sps:$4 sm:$0xff]  }
  0x55   :  { %v1669_v49 = vld [vmem:[#allocation8 + $0x80] ss:$12 sps:$4 sm:$0xff]  }
  0x56   :  { %v1670_v50 = vld [vmem:[#allocation8 + $0x200] ss:$12 sps:$4 sm:$0xff]  }
  0x57   :  { %1056 = vmatpush2.bf16.msra.mxu0 %v1623_v51  ;;  %1097 = vmatpush2.bf16.msra.mxu1 %v1626_v52  ;;  %v1671_v51 = vld [vmem:[#allocation8 + $0x128] ss:$12 sps:$4 sm:$0xff]  }
  0x58   :  { %1057 = vmatprep.subr.bf16.mxu0 %v1631_v53  ;;  %1098 = vmatprep.subr.bf16.mxu1 %v1634_v54  ;;  %v1672_v52 = vld [vmem:[#allocation8 + $0x2a8] ss:$12 sps:$4 sm:$0xff]  }
  0x59   :  { %v1673_v53 = vld [vmem:[#allocation8 + $0x68] ss:$12 sps:$4 sm:$0xff]  }
  0x5a   :  { %v1674_v54 = vld [vmem:[#allocation8 + $0x1e8] ss:$12 sps:$4 sm:$0xff]  }
  0x5b   :  { %1058 = vmatpush2.bf16.msra.mxu0 %v1629_v55  ;;  %1099 = vmatpush2.bf16.msra.mxu1 %v1632_v56  ;;  %v1675_v55 = vld [vmem:[#allocation8 + $0x110] ss:$12 sps:$4 sm:$0xff]  }
  0x5c   :  { %1059 = vmatprep.subr.bf16.mxu0 %v1637_v57  ;;  %1100 = vmatprep.subr.bf16.mxu1 %v1640_v58  ;;  %v1676_v56 = vld [vmem:[#allocation8 + $0x290] ss:$12 sps:$4 sm:$0xff]  }
  0x5d   :  { %v1677_v57 = vld [vmem:[#allocation8 + $0x50] ss:$12 sps:$4 sm:$0xff]  }
  0x5e   :  { %v1678_v58 = vld [vmem:[#allocation8 + $0x1d0] ss:$12 sps:$4 sm:$0xff]  }
  0x5f   :  { %1060 = vmatpush2.bf16.msra.mxu0 %v1635_v59  ;;  %1101 = vmatpush2.bf16.msra.mxu1 %v1638_v60  ;;  %v1679_v59 = vld [vmem:[#allocation8 + $0xf8] ss:$12 sps:$4 sm:$0xff]  }
  0x60   :  { %1061 = vmatprep.subr.bf16.mxu0 %v1643_v61  ;;  %1102 = vmatprep.subr.bf16.mxu1 %v1646_v62  ;;  %v1680_v60 = vld [vmem:[#allocation8 + $0x278] ss:$12 sps:$4 sm:$0xff]  }
  0x61   :  { %v1681_v61 = vld [vmem:[#allocation8 + $0x38] ss:$12 sps:$4 sm:$0xff]  }
  0x62   :  { %v1682_v62 = vld [vmem:[#allocation8 + $0x1b8] ss:$12 sps:$4 sm:$0xff]  }
  0x63   :  { %1062 = vmatpush2.bf16.msra.mxu0 %v1641_v63  ;;  %1103 = vmatpush2.bf16.msra.mxu1 %v1644_v1  ;;  %v1683_v63 = vld [vmem:[#allocation8 + $0xe0] ss:$12 sps:$4 sm:$0xff]  }
  0x64   :  { %1063 = vmatprep.subr.bf16.mxu0 %v1649_v2  ;;  %1104 = vmatprep.subr.bf16.mxu1 %v1652_v3  ;;  %v1684_v1 = vld [vmem:[#allocation8 + $0x260] ss:$12 sps:$4 sm:$0xff]  }
  0x65   :  { %v1685_v2 = vld [vmem:[#allocation8 + $0x20] ss:$12 sps:$4 sm:$0xff]  }
  0x66   :  { %v1686_v3 = vld [vmem:[#allocation8 + $0x1a0] ss:$12 sps:$4 sm:$0xff]  }
  0x67   :  { %1064 = vmatpush2.bf16.msra.mxu0 %v1647_v4  ;;  %1105 = vmatpush2.bf16.msra.mxu1 %v1650_v5  ;;  %v1687_v4 = vld [vmem:[#allocation8 + $0xc8] ss:$12 sps:$4 sm:$0xff]  }
  0x68   :  { %1065 = vmatprep.subr.bf16.mxu0 %v1655_v6  ;;  %1106 = vmatprep.subr.bf16.mxu1 %v1658_v7  ;;  %v1688_v5 = vld [vmem:[#allocation8 + $0x248] ss:$12 sps:$4 sm:$0xff]  }
  0x69   :  { %v1689_v6 = vld [vmem:[#allocation8 + $0x8] ss:$12 sps:$4 sm:$0xff]  }
  0x6a   :  { %v1690_v7 = vld [vmem:[#allocation8 + $0x188] ss:$12 sps:$4 sm:$0xff]  }
  0x6b   :  { %1066 = vmatpush2.bf16.msra.mxu0 %v1653_v8  ;;  %1107 = vmatpush2.bf16.msra.mxu1 %v1656_v9  ;;  %v1220_v8 = vld [vmem:[%s1893_s5] sm:$0x7] }
  0x6c   :  { %1499 = vmatprep.subr.bf16.mxu0 %v1659_v10  ;;  %1521 = vmatprep.subr.bf16.mxu1 %v1660_v11  ;;  %v1231_v9 = vrot.slane %v1220_v8, %v1851_v17 }
  0xe9   :  { %v144_v23 = vpop.f32.mrf.mxu0  ;;  %v215_v24 = vpop.f32.mrf.mxu1 }
  0xea   :  { %v383_v25 = vadd.f32 %v366_v19, %v144_v23  ;;  %v385_v26 = vadd.f32 %v374_v20, %v215_v24  ;;  %v1202_v19 = vrot.slane %v1197_v12, %v1844_v14  ;;  %v1206_v23 = vrot.slane %v1197_v12, %v1851_v17 }
  0xeb   :  { %v146_v27 = vpop.f32.mrf.mxu0  ;;  %v217_v28 = vpop.f32.mrf.mxu1 }
  0xec   :  { %v389_v29 = vmax.f32 %v385_v26, 0.0  ;;  %v384_v30 = vadd.f32 %v370_v21, %v146_v27  ;;  %v386_v31 = vadd.f32 %v378_v22, %v217_v28  ;;  %v387_v32 = vmax.f32 %v383_v25, 0.0 }
  0xed   :  { %v286_v10 = vpop.f32.mrf.mxu0 }
  0xee   :  { %v388_v33 = vmax.f32 %v384_v30, 0.0  ;;  %v390_v34 = vmax.f32 %v386_v31, 0.0  ;;  %v1856_v35 = vpop.f32.mrf.mxu1  ;;  %v1858_v36 = vpack.c.bf16 %v389_v29, %v389_v29  ;;  %v1860_v42 = vpack.c.bf16 %v387_v32, %v387_v32 }
  0xef   :  { %v288_v11 = vpop.f32.mrf.mxu0 }
  0xf0   :  { %v392_v37 = vpack.c.bf16 %v388_v33, %v388_v33  ;;  %v394_v38 = vpack.c.bf16 %v390_v34, %v390_v34  ;;  %v1549_v41 = vpop.f32.mrf.mxu1  ;;  %v1227_v33 = vrot.slane %v1220_v8, %v1844_v14  ;;  %v1235_v14 = vrot.slane %v1220_v8, %v1846_v15 }
  0xf2   :  { %1067 = vmatprep.mubr.bf16.mxu0 %v392_v37  ;;  %1108 = vmatprep.mubr.bf16.mxu1 %v394_v38 }
  0xf3   :  { %1068 = vmatmul.mubr.bf16.vlgmr.msra.gmra.mxu0 %v1860_v42  ;;  %1109 = vmatmul.mubr.bf16.vlgmr.msra.gmra.mxu1 %v1858_v36 }
  0xf4   :  { %1500 = vmatpush3.bf16.msra.mxu0 %v1661_v39  ;;  %1522 = vmatpush3.bf16.msra.mxu1 %v1662_v40 }
  0xf5   :  { %1149 = vmatprep.mubr.bf16.mxu0 %v392_v37  ;;  %1189 = vmatprep.mubr.bf16.mxu1 %v394_v38 }
  0xf6   :  { %1501 = vmatprep.subr.bf16.mxu0 %v1663_v43  ;;  %1523 = vmatprep.subr.bf16.mxu1 %v1664_v44  ;;  %v1210_v43 = vrot.slane %v1197_v12, %v1846_v15 }
  0xf8   :  { %1502 = vmatpush3.bf16.msra.mxu0 %v1665_v45  ;;  %1524 = vmatpush3.bf16.msra.mxu1 %v1666_v46 }
  0xf9   :  { %1503 = vmatprep.subr.bf16.mxu0 %v1667_v47  ;;  %1525 = vmatprep.subr.bf16.mxu1 %v1668_v48 }
  0xfc   :  { %1504 = vmatpush3.bf16.msra.mxu0 %v1669_v49  ;;  %1526 = vmatpush3.bf16.msra.mxu1 %v1670_v50 }
  0xfd   :  { %1505 = vmatprep.subr.bf16.mxu0 %v1671_v51  ;;  %1527 = vmatprep.subr.bf16.mxu1 %v1672_v52  ;;  %v1222_v51 = vstv %s1894_s6 }
 0x100   :  { %1506 = vmatpush3.bf16.msra.mxu0 %v1673_v53  ;;  %1528 = vmatpush3.bf16.msra.mxu1 %v1674_v54 }
 0x101   :  { %1507 = vmatprep.subr.bf16.mxu0 %v1675_v55  ;;  %1529 = vmatprep.subr.bf16.mxu1 %v1676_v56 }
 0x104   :  { %1508 = vmatpush3.bf16.msra.mxu0 %v1677_v57  ;;  %1530 = vmatpush3.bf16.msra.mxu1 %v1678_v58 }
 0x105   :  { %1509 = vmatprep.subr.bf16.mxu0 %v1679_v59  ;;  %1531 = vmatprep.subr.bf16.mxu1 %v1680_v60 }
 0x108   :  { %1510 = vmatpush3.bf16.msra.mxu0 %v1681_v61  ;;  %1532 = vmatpush3.bf16.msra.mxu1 %v1682_v62 }
 0x109   :  { %1511 = vmatprep.subr.bf16.mxu0 %v1683_v63  ;;  %1533 = vmatprep.subr.bf16.mxu1 %v1684_v1 }
 0x10c   :  { %1512 = vmatpush3.bf16.msra.mxu0 %v1685_v2  ;;  %1534 = vmatpush3.bf16.msra.mxu1 %v1686_v3 }
 0x10d   :  { %1513 = vmatprep.subr.bf16.mxu0 %v1687_v4  ;;  %1535 = vmatprep.subr.bf16.mxu1 %v1688_v5 }
 0x110   :  { %1514 = vmatpush3.bf16.msra.mxu0 %v1689_v6  ;;  %1536 = vmatpush3.bf16.msra.mxu1 %v1690_v7 }
 0x111   :  { %1550 = vmatprep.subr.mxu1 %v1782_v0 }
 0x113   :  { %1150 = vmatmul.mubr.bf16.vlgmr.msra.gmra.mxu0 %v1860_v42  ;;  %1190 = vmatmul.mubr.bf16.vlgmr.msra.gmra.mxu1 %v1858_v36 }
 0x114   :  { %1552 = vmatprep.mubr.msk.f32.mxu1 %vm1783_vm1, %v1782_v0  ;;  %1303 = vmatprep.mubr.f32.mxu0 %v1231_v9 }
 0x1b3   :  { %v1069_v13 = vpop.f32.mrf.mxu0  ;;  %v1110_v16 = vpop.f32.mrf.mxu1 }
 0x1b4   :  { %v1070_v18 = vadd.f32 %v1069_v13, %v286_v10 }
 0x1b5   :  { %v1071_v20 = vpop.f32.mrf.mxu0  ;;  %v1112_v0 = vpop.f32.mrf.mxu1 }
 0x1b6   :  { %v1111_v21 = vadd.f32 %v1110_v16, %v1070_v18  ;;  %v1072_v22 = vadd.f32 %v1071_v20, %v288_v11 }
 0x1b7   :  { %v1073_v24 = vpop.f32.mrf.mxu0  ;;  %v1114_v25 = vpop.f32.mrf.mxu1 }
 0x1b8   :  { %v1113_v26 = vadd.f32 %v1112_v0, %v1072_v22  ;;  %v1214_v27 = vadd.f32 %v1202_v19, %v1111_v21 }
 0x1b9   :  { %v1074_v28 = vpop.f32.mrf.mxu0  ;;  %v1115_v29 = vpop.f32.mrf.mxu1 }
 0x1ba   :  { %v1215_v30 = vadd.f32 %v1206_v23, %v1113_v26  ;;  %v1217_v32 = vmax.f32 %v1214_v27, 0.0 }
 0x1bc   :  { %v1218_v31 = vmax.f32 %v1215_v30, 0.0 }
 0x1be   :  { %1269 = vmatprep.subr.mxu0 %v1218_v31 }
 0x1bf   :  { %1270 = vmatpush1.xpose.msra.mxu0 %v1217_v32 }
 0x1c2   :  { %1304 = vmatmul.mubr.f32.vlgmr.msra.gmra.mxu0 %v1227_v33 }
 0x1d3   :  { %v1515_v34 = vpop.f32.mrf.mxu0  ;;  %v1537_v36 = vpop.f32.mrf.mxu1 }
 0x1d5   :  { %v1516_v37 = vpop.f32.mrf.mxu0  ;;  %v1538_v38 = vpop.f32.mrf.mxu1 }
 0x1d6   :  { %v1517_v39 = vadd.f32 %v1516_v37, %v1515_v34  ;;  %v1539_v42 = vadd.f32 %v1538_v38, %v1537_v36 }
 0x1d7   :  { %v1518_v17 = vpop.f32.mrf.mxu0  ;;  %v1540_v40 = vpop.f32.mrf.mxu1 }
 0x1d8   :  { %v1152_v41 = vadd.f32 %v1517_v39, %v1856_v35 }
 0x1d9   :  { %v1519_v44 = vpop.f32.mrf.mxu0  ;;  %v1541_v45 = vpop.f32.mrf.mxu1 }
 0x1da   :  { %v1192_v46 = vadd.f32 %v1539_v42, %v1152_v41 }
 0x1dc   :  { %v1216_v47 = vadd.f32 %v1210_v43, %v1192_v46 }
 0x1de   :  { %v1219_v48 = vmax.f32 %v1216_v47, 0.0 }
 0x1e0   :  { %1551 = vmatpush3.xpose.msra.mxu1 %v1219_v48 }
 0x1e3   :  { %1553 = vmatmul.mubr.f32.vlgmr.msra.gmra.mxu1 %v1235_v14 }
 0x282   :  { %v1305_v49 = vpop.f32.mrf.mxu0 }
 0x283   :  { %v1306_v52 = vadd.f32 %v1305_v49, %v1222_v51 }
 0x284   :  { %v1307_v50 = vpop.f32.mrf.mxu0 }
 0x2a3   :  { %v1375_v35 = vpop.f32.mrf.mxu1 }
 0x2a4   :  { %v1376_v53 = vadd.f32 %v1375_v35, %v1306_v52 }
 0x2a5   :  { %v1554_v54 = vpop.f32.mrf.mxu1 }
 0x2a6   :  { %1380 = vst.msk [vmem:[#allocation9] sm:$0x1] %vm1379_vm2, %v1376_v53 }
 0x2a7   :  { %1762 = shalt.err (!%p1759_p5)
}
 0x2a8   :  { %1390 = dma.vmem_to_hbm [thread:$0]  %s1388_s21, 16, %s1895_s7, [#allocation5]  }
 0x2a9   :  { %1775 = dma.done.wait [#allocation5], 16  }
 0x2aa   :  { %1776 = vsyncadd [#allocation5], 4294967280 }
 0x2ab   :  { %1394 = vsyncpa [#allocation4], 1 }
 0x2ac   :  { %1395 = vsyncpa [#allocation7], 1 }
 0x2ad   :  { %1396 = vsyncpa [#allocation5], 1 }

</bundles_post_ra>
